<compile_context>
chip_gen: v6e
topology: v6e:2x2x1
jax: 0.10.0
libtpu: 0.0.40
codegen_flags: <defaults>
</compile_context>

<pallas_src>
import math
from functools import partial

import jax
import jax.numpy as jnp
from jax.experimental import pallas as pl
from jax.experimental.pallas import tpu as pltpu


def _bert_embeddings_kernel(x_ref, w_ref, pe_ref, g_ref, b_ref, o_ref, acc_ref,
                            *, eps: float, inv_h: float, compute_dtype):
    # x_ref:  (ts, tk) f32      w_ref: (tk, H) bf16
    # pe_ref: (ts, H) f32 (word-embedding bias already folded in)
    # g_ref/b_ref: (1, H) f32   o_ref: (ts, H) bf16   acc_ref: (ts, H) f32
    k = pl.program_id(1)

    @pl.when(k == 0)
    def _init():
        # Start the accumulator at (bias + positional encoding): saves a
        # zero-fill and the epilogue add.
        acc_ref[...] = pe_ref[...]

    # Partial word-embedding matmul on the MXU; x is cast to bf16 in-kernel
    # (no separate wrapper-side cast pass over the largest operand).
    acc_ref[...] += jnp.dot(x_ref[...].astype(compute_dtype), w_ref[...],
                            preferred_element_type=jnp.float32)

    @pl.when(k == pl.num_programs(1) - 1)
    def _finalize():
        y = acc_ref[...]
        # Two-pass LayerNorm statistics (centered variance — robust to the
        # mean shift introduced by bias + positional encoding).
        mean = jnp.sum(y, axis=-1, keepdims=True) * inv_h
        yc = y - mean
        var = jnp.sum(yc * yc, axis=-1, keepdims=True) * inv_h
        out = yc * jax.lax.rsqrt(var + eps) * g_ref[...] + b_ref[...]
        # dropout in eval mode is identity
        # TODO(synk): training-mode dropout not implemented
        o_ref[...] = out.astype(o_ref.dtype)


def _pick_tile(dim: int, target: int, align: int) -> int:
    """Largest multiple of `align` that divides `dim` and is <= target; else full dim."""
    t = min(target, dim)
    t -= t % align
    while t >= align:
        if dim % t == 0:
            return t
        t -= align
    return dim


def bert_embeddings_pallas(inputs_embeds, w_vh, bias_h, pe_sh, gamma_h, beta_h,
                           *, eps=1e-12, seq_tile=512, vocab_tile=None,
                           compute_dtype=jnp.bfloat16, out_dtype=jnp.bfloat16):
    """inputs_embeds: (B, S, V); w_vh: (V, H) (pre-transposed nn.Linear weight,
    ideally already bf16); pe_sh: (S, H) positional-encoding table."""
    B, S, V = inputs_embeds.shape
    H = w_vh.shape[1]
    assert pe_sh.shape == (S, H), (
        "module broadcast requires seq_len == max_position_embeddings")

    M = B * S  # flatten (B, S) -> M: bigger MXU tiles, fewer grid steps

    # --- physical VMEM with ~25% headroom (v7x: 64 MiB/TC, v5e/v6e: 128 MiB) ---
    phys_vmem = 64 * 1024 * 1024
    try:
        info = pltpu.get_tpu_info()
        phys_vmem = int(getattr(info, "vmem_capacity_bytes", phys_vmem)) or phys_vmem
    except Exception:
        pass
    vmem_budget = min(int(phys_vmem * 3 // 4), 100 * 1024 * 1024)

    out_itm = jnp.dtype(out_dtype).itemsize
    cmp_itm = jnp.dtype(compute_dtype).itemsize

    # Tiny weights: skip K-tiling entirely so the whole weight sits resident.
    if vocab_tile is None:
        vocab_tile = V if V * H * cmp_itm <= 4 * 1024 * 1024 else 1024

    sub_align = 16                       # satisfies f32 (8) and bf16 (16) sublanes
    ts = _pick_tile(M, seq_tile, sub_align)
    tk = _pick_tile(V, vocab_tile, 128)

    def footprint(ts_, tk_):
        return (2 * ts_ * tk_ * 4            # x double buffer (f32)
                + 2 * tk_ * H * cmp_itm      # W double buffer (bf16)
                + 2 * ts_ * H * 4            # pe+bias double buffer (f32)
                + 2 * ts_ * H * out_itm      # output double buffer
                + ts_ * H * 4                # f32 accumulator scratch
                + 4 * H * 4)                 # gamma / beta

    # Shrink the row tile if the double-buffered footprint exceeds the budget.
    for _ in range(8):
        if footprint(ts, tk) <= vmem_budget or ts <= sub_align:
            break
        new_ts = _pick_tile(M, max(sub_align, ts // 2), sub_align)
        if new_ts >= ts:
            break
        ts = new_ts

    # Streamed operands: x stays f32 (cast inside the kernel), W bf16.
    x_m = inputs_embeds.reshape(M, V)
    w = w_vh if w_vh.dtype == compute_dtype else w_vh.astype(compute_dtype)

    # Fold the word-embedding bias into the PE table; broadcast across batch.
    pe_bias = pe_sh.astype(jnp.float32) + bias_h.astype(jnp.float32)[None, :]
    pe_bias_m = jnp.tile(pe_bias, (B, 1))                           # (M, H)
    gamma2 = gamma_h.reshape(1, H).astype(jnp.float32)
    beta2 = beta_h.reshape(1, H).astype(jnp.float32)

    grid = (M // ts, V // tk)

    out_m = pl.pallas_call(
        partial(_bert_embeddings_kernel, eps=float(eps), inv_h=1.0 / float(H),
                compute_dtype=compute_dtype),
        out_shape=jax.ShapeDtypeStruct((M, H), out_dtype),
        grid_spec=pltpu.PrefetchScalarGridSpec(
            num_scalar_prefetch=0,
            grid=grid,
            in_specs=[
                pl.BlockSpec((ts, tk), lambda i, k: (i, k)),   # inputs_embeds (f32)
                pl.BlockSpec((tk, H),  lambda i, k: (k, 0)),   # word weight (bf16)
                pl.BlockSpec((ts, H),  lambda i, k: (i, 0)),   # bias + pos-enc (f32)
                pl.BlockSpec((1, H),   lambda i, k: (0, 0)),   # LN gamma
                pl.BlockSpec((1, H),   lambda i, k: (0, 0)),   # LN beta
            ],
            out_specs=pl.BlockSpec((ts, H), lambda i, k: (i, 0)),
            scratch_shapes=[pltpu.VMEM((ts, H), jnp.float32)],
        ),
        compiler_params=pltpu.CompilerParams(
            dimension_semantics=("parallel", "arbitrary"),
            vmem_limit_bytes=int(vmem_budget),
        ),
    )(x_m, w, pe_bias_m, gamma2, beta2)

    return out_m.reshape(B, S, H)


def make_sinusoidal_pe(max_len, d_model):
    # Matches PositionalEncoding.__init__ (pe[:, 0, :] slice as [max_len, d_model]).
    position = jnp.arange(max_len, dtype=jnp.float32)[:, None]
    div_term = jnp.exp(jnp.arange(0, d_model, 2, dtype=jnp.float32)
                       * (-math.log(10000.0) / d_model))
    pe = jnp.zeros((max_len, d_model), dtype=jnp.float32)
    pe = pe.at[:, 0::2].set(jnp.sin(position * div_term))
    pe = pe.at[:, 1::2].set(jnp.cos(position * div_term))
    return pe


if __name__ == "__main__":
    # Small config: vocab=1024, hidden=128 (lane-dense), max_position_embeddings == seq == 16, batch=2.
    B, S, V, H = 2, 16, 1024, 128
    eps = 1e-12

    key = jax.random.PRNGKey(0)
    kx, kw, kb = jax.random.split(key, 3)

    inputs_embeds = jax.random.normal(kx, (B, S, V), dtype=jnp.float32)

    # Deterministic synthetic parameters (shapes from nn.Linear(V, H) / nn.LayerNorm(H)).
    w_hv = jax.random.normal(kw, (H, V), dtype=jnp.float32) * (1.0 / math.sqrt(V))
    bias_h = jax.random.normal(kb, (H,), dtype=jnp.float32) * 0.01
    gamma_h = jnp.ones((H,), dtype=jnp.float32)
    beta_h = jnp.zeros((H,), dtype=jnp.float32)

    pe_sh = make_sinusoidal_pe(S, H)          # pe[:max_pos, 0, :] -> (S, H)

    # Weight pre-transposed to (V, H) and pre-cast to bf16 once (outside the per-call path).
    w_vh_bf16 = jnp.asarray(w_hv.T, dtype=jnp.bfloat16)

    # Pure-JAX reference (same bf16 rounding of the matmul operands, f32 LN math).
    xb = inputs_embeds.astype(jnp.bfloat16).astype(jnp.float32)
    wb = w_hv.astype(jnp.bfloat16).astype(jnp.float32)
    y_ref = jnp.einsum("bsv,hv->bsh", xb, wb) + bias_h + pe_sh[None]
    mean = jnp.mean(y_ref, axis=-1, keepdims=True)
    var = jnp.mean((y_ref - mean) ** 2, axis=-1, keepdims=True)
    ref = (y_ref - mean) / jnp.sqrt(var + eps) * gamma_h + beta_h

    # Config A: auto tiles -> (B*S) flattened into one 32-row tile, weight
    # resident (tk == V), grid (1, 1).
    out_a = bert_embeddings_pallas(inputs_embeds, w_vh_bf16, bias_h, pe_sh,
                                   gamma_h, beta_h, eps=eps)
    out_a = jax.block_until_ready(out_a)

    # Config B: force a multi-step grid (2 row tiles x 4 K steps) to exercise
    # the accumulator init/finalize pipeline.
    out_b = bert_embeddings_pallas(inputs_embeds, w_vh_bf16, bias_h, pe_sh,
                                   gamma_h, beta_h, eps=eps,
                                   seq_tile=16, vocab_tile=256)
    out_b = jax.block_until_ready(out_b)

    for out in (out_a, out_b):
        assert out.shape == (B, S, H)
        assert out.dtype == jnp.bfloat16
        assert jnp.allclose(out.astype(jnp.float32), ref, atol=2e-2, rtol=2e-2), \
            "mismatch vs reference"
    print("KERNEL_OK")
</pallas_src>

<mosaic_0001>
module attributes {stable_mosaic.version = 11 : i64} {
  func.func @_bert_embeddings_kernel(%arg0: i32, %arg1: i32, %arg2: memref<32x1024xf32, #tpu.memory_space<vmem>>, %arg3: memref<1024x128xbf16, #tpu.memory_space<vmem>>, %arg4: memref<32x128xf32, #tpu.memory_space<vmem>>, %arg5: memref<1x128xf32, #tpu.memory_space<vmem>>, %arg6: memref<1x128xf32, #tpu.memory_space<vmem>>, %arg7: memref<32x128xbf16, #tpu.memory_space<vmem>>, %arg8: memref<32x128xf32, #tpu.memory_space<vmem>>) attributes {dimension_semantics = [#tpu.dimension_semantics<parallel>, #tpu.dimension_semantics<arbitrary>], iteration_bounds = array<i64: 1, 1>, scalar_prefetch = 0 : i64, scratch_operands = 1 : i64, tpu.core_type = #tpu.core_type<tc>, window_params = [{transform_indices = @transform_0, window_bounds = array<i64: 32, 1024>}, {transform_indices = @transform_1, window_bounds = array<i64: 1024, 128>}, {transform_indices = @transform_2, window_bounds = array<i64: 32, 128>}, {pipeline_mode = #tpu.pipeline_mode<synchronous>, transform_indices = @transform_3, window_bounds = array<i64: 1, 128>}, {pipeline_mode = #tpu.pipeline_mode<synchronous>, transform_indices = @transform_4, window_bounds = array<i64: 1, 128>}, {transform_indices = @transform_5, window_bounds = array<i64: 32, 128>}]} {
    %c0_i32 = arith.constant 0 : i32
    %0 = arith.cmpi eq, %arg1, %c0_i32 : i32
    %1 = arith.extui %0 : i1 to i32
    %c0_i32_0 = arith.constant 0 : i32
    %2 = arith.cmpi ne, %1, %c0_i32_0 : i32
    scf.if %2 {
      %c0_10 = arith.constant 0 : index
      %c0_11 = arith.constant 0 : index
      %13 = vector.load %arg4[%c0_10, %c0_11] : memref<32x128xf32, #tpu.memory_space<vmem>>, vector<32x128xf32>
      %c0_12 = arith.constant 0 : index
      %c0_13 = arith.constant 0 : index
      %14 = vector.load %arg8[%c0_12, %c0_13] : memref<32x128xf32, #tpu.memory_space<vmem>>, vector<32x128xf32>
      tpu.vector_store %arg8[%c0_12, %c0_13], %13 {strides = array<i32>} : memref<32x128xf32, #tpu.memory_space<vmem>>, vector<32x128xf32>,
    } else {
    }
    %c0 = arith.constant 0 : index
    %c0_1 = arith.constant 0 : index
    %3 = vector.load %arg8[%c0, %c0_1] : memref<32x128xf32, #tpu.memory_space<vmem>>, vector<32x128xf32>
    %c0_2 = arith.constant 0 : index
    %c0_3 = arith.constant 0 : index
    %4 = vector.load %arg2[%c0_2, %c0_3] : memref<32x1024xf32, #tpu.memory_space<vmem>>, vector<32x1024xf32>
    %5 = arith.truncf %4 : vector<32x1024xf32> to vector<32x1024xbf16>
    %c0_4 = arith.constant 0 : index
    %c0_5 = arith.constant 0 : index
    %6 = vector.load %arg3[%c0_4, %c0_5] : memref<1024x128xbf16, #tpu.memory_space<vmem>>, vector<1024x128xbf16>
    %cst = arith.constant dense<0.000000e+00> : vector<32x128xf32>
    %7 = tpu.matmul %5, %6, %cst {dimension_numbers = #tpu.dot_dimension_numbers<[1], [0], [0], [1], [0, 0, 1, 1], [], []>} : vector<32x1024xbf16>, vector<1024x128xbf16>, vector<32x128xf32> -> vector<32x128xf32>
    %8 = arith.addf %3, %7 : vector<32x128xf32>
    %c0_6 = arith.constant 0 : index
    %c0_7 = arith.constant 0 : index
    %9 = vector.load %arg8[%c0_6, %c0_7] : memref<32x128xf32, #tpu.memory_space<vmem>>, vector<32x128xf32>
    tpu.vector_store %arg8[%c0_6, %c0_7], %8 {strides = array<i32>} : memref<32x128xf32, #tpu.memory_space<vmem>>, vector<32x128xf32>,
    %c0_i32_8 = arith.constant 0 : i32
    %10 = arith.cmpi eq, %arg1, %c0_i32_8 : i32
    %11 = arith.extui %10 : i1 to i32
    %c0_i32_9 = arith.constant 0 : i32
    %12 = arith.cmpi ne, %11, %c0_i32_9 : i32
    scf.if %12 {
      %c0_10 = arith.constant 0 : index
      %c0_11 = arith.constant 0 : index
      %13 = vector.load %arg8[%c0_10, %c0_11] : memref<32x128xf32, #tpu.memory_space<vmem>>, vector<32x128xf32>
      %cst_12 = arith.constant dense<0.000000e+00> : vector<32xf32>
      %14 = vector.multi_reduction <add>, %13, %cst_12 [1] : vector<32x128xf32> to vector<32xf32>
      %15 = vector.shape_cast %14 : vector<32xf32> to vector<32x1xf32>
      %cst_13 = arith.constant 7.812500e-03 : f32
      %16 = vector.broadcast %cst_13 : f32 to vector<32x1xf32>
      %17 = arith.mulf %15, %16 : vector<32x1xf32>
      %18 = vector.broadcast %17 : vector<32x1xf32> to vector<32x128xf32>
      %19 = arith.subf %13, %18 : vector<32x128xf32>
      %20 = arith.mulf %19, %19 : vector<32x128xf32>
      %cst_14 = arith.constant dense<0.000000e+00> : vector<32xf32>
      %21 = vector.multi_reduction <add>, %20, %cst_14 [1] : vector<32x128xf32> to vector<32xf32>
      %22 = vector.shape_cast %21 : vector<32xf32> to vector<32x1xf32>
      %cst_15 = arith.constant 7.812500e-03 : f32
      %23 = vector.broadcast %cst_15 : f32 to vector<32x1xf32>
      %24 = arith.mulf %22, %23 : vector<32x1xf32>
      %cst_16 = arith.constant 9.99999996E-13 : f32
      %25 = vector.broadcast %cst_16 : f32 to vector<32x1xf32>
      %26 = arith.addf %24, %25 : vector<32x1xf32>
      %27 = math.rsqrt %26 : vector<32x1xf32>
      %28 = vector.broadcast %27 : vector<32x1xf32> to vector<32x128xf32>
      %29 = arith.mulf %19, %28 : vector<32x128xf32>
      %c0_17 = arith.constant 0 : index
      %c0_18 = arith.constant 0 : index
      %30 = vector.load %arg5[%c0_17, %c0_18] : memref<1x128xf32, #tpu.memory_space<vmem>>, vector<1x128xf32>
      %31 = vector.broadcast %30 : vector<1x128xf32> to vector<32x128xf32>
      %32 = arith.mulf %29, %31 : vector<32x128xf32>
      %c0_19 = arith.constant 0 : index
      %c0_20 = arith.constant 0 : index
      %33 = vector.load %arg6[%c0_19, %c0_20] : memref<1x128xf32, #tpu.memory_space<vmem>>, vector<1x128xf32>
      %34 = vector.broadcast %33 : vector<1x128xf32> to vector<32x128xf32>
      %35 = arith.addf %32, %34 : vector<32x128xf32>
      %36 = arith.truncf %35 : vector<32x128xf32> to vector<32x128xbf16>
      %c0_21 = arith.constant 0 : index
      %c0_22 = arith.constant 0 : index
      %37 = vector.load %arg7[%c0_21, %c0_22] : memref<32x128xbf16, #tpu.memory_space<vmem>>, vector<32x128xbf16>
      tpu.vector_store %arg7[%c0_21, %c0_22], %36 {strides = array<i32>} : memref<32x128xbf16, #tpu.memory_space<vmem>>, vector<32x128xbf16>,
    } else {
    }
    return
  }
  func.func @transform_0(%arg0: i32, %arg1: i32) -> (i32, i32) {
    %c0_i32 = arith.constant 0 : i32
    return %arg0, %arg1 : i32, i32
  }
  func.func @transform_1(%arg0: i32, %arg1: i32) -> (i32, i32) {
    %c0_i32 = arith.constant 0 : i32
    %c0_i32_0 = arith.constant 0 : i32
    return %arg1, %c0_i32 : i32, i32
  }
  func.func @transform_2(%arg0: i32, %arg1: i32) -> (i32, i32) {
    %c0_i32 = arith.constant 0 : i32
    %c0_i32_0 = arith.constant 0 : i32
    return %arg0, %c0_i32 : i32, i32
  }
  func.func @transform_3(%arg0: i32, %arg1: i32) -> (i32, i32) {
    %c0_i32 = arith.constant 0 : i32
    %c0_i32_0 = arith.constant 0 : i32
    %c0_i32_1 = arith.constant 0 : i32
    return %c0_i32, %c0_i32_0 : i32, i32
  }
  func.func @transform_4(%arg0: i32, %arg1: i32) -> (i32, i32) {
    %c0_i32 = arith.constant 0 : i32
    %c0_i32_0 = arith.constant 0 : i32
    %c0_i32_1 = arith.constant 0 : i32
    return %c0_i32, %c0_i32_0 : i32, i32
  }
  func.func @transform_5(%arg0: i32, %arg1: i32) -> (i32, i32) {
    %c0_i32 = arith.constant 0 : i32
    %c0_i32_0 = arith.constant 0 : i32
    return %arg0, %c0_i32 : i32, i32
  }
}

</mosaic_0001>

<bundles_post_ra>
// kernel: tpu_custom_call.1
= control target key start
LH: loop header
LB: loop body
LE: loop exit
PB: predicated region body
PF: predicated region fallthrough
CT: control target
= control target key end

     0   :  { %10 = vsyncpa [#allocation4], 0  ;;  %s1382_s0 = inlined_call_operand.hbm [shape: f32[32,1024], index: 0, kind: input, shape index: {}]   ;;  %s1383_s1 = inlined_call_operand.hbm [shape: bf16[1024,128], index: 1, kind: input, shape index: {}]   ;;  %s1384_s2 = inlined_call_operand.hbm [shape: f32[32,128], index: 2, kind: input, shape index: {}]   ;;  %s1385_s3 = inlined_call_operand.vmem [shape: f32[1,128], index: 3, kind: input, shape index: {}]   ;;  %s1386_s4 = inlined_call_operand.vmem [shape: f32[1,128], index: 4, kind: input, shape index: {}]   ;;  %s1387_s5 = inlined_call_operand.hbm [shape: bf16[32,128], index: 5, kind: output, shape index: {}]  }
   0x1   :  { %11 = vsyncpa [#allocation7], 0 }
   0x2   :  { %12 = vsyncpa [#allocation5], 0  ;;  %s1318_s18 = smov [#allocation6]  }
   0x3   :  { %s30_s19 = sshll.u32 %s1318_s18, 4  ;;  %s31_s19 = int_to_ptr.vmem [resolvable:$true] %s30_s19 }
   0x4   :  { %s1240_s20 = scalar_lea.vmem %s31_s19, 8192  ;;  %p1245_p1 = scmp.lt.s32.totalorder %s31_s19, %s31_s19 }
   0x5   :  { %p1241_p0 = scmp.ne.s32.totalorder %s31_s19, %s1240_s20  ;;  %p1246_p2 = scmp.lt.s32.totalorder %s1240_s20, %s1240_s20 }
   0x7   :  { %p1247_p3 = por %p1246_p2, %p1245_p1 }
   0x9   :  { %p1248_p4 = pnand %p1247_p3, %p1241_p0 }
   0xb   :  { %1251 = shalt.err (!%p1248_p4)
}
   0xc   :  { %s1319_s21 = smov 64   ;;  %s1320_s22 = smov 4  }
   0xd   :  { %36 = dma.hbm_to_vmem [thread:$0]  %s1383_s1, 8192, %s31_s19, [#allocation7], %s1319_s21, %s1319_s21, %s1320_s22  }
   0xe   :  { %s1321_s25 = smov [#allocation3]  }
   0xf   :  { %s18_s26 = sshll.u32 %s1321_s25, 4  ;;  %s19_s26 = int_to_ptr.vmem [resolvable:$true] %s18_s26 }
  0x10   :  { %s1260_s27 = scalar_lea.vmem %s19_s26, 4096  ;;  %p1265_p6 = scmp.lt.s32.totalorder %s19_s26, %s19_s26 }
  0x11   :  { %p1261_p5 = scmp.ne.s32.totalorder %s19_s26, %s1260_s27  ;;  %p1266_p7 = scmp.lt.s32.totalorder %s1260_s27, %s1260_s27 }
  0x13   :  { %p1267_p8 = por %p1266_p7, %p1265_p6 }
  0x15   :  { %p1268_p9 = pnand %p1267_p8, %p1261_p5 }
  0x17   :  { %1271 = shalt.err (!%p1268_p9)
}
  0x18   :  { %s1322_s28 = smov 1024   ;;  %s1323_s6 = smov [#allocation8]  }
  0x19   :  { %24 = dma.hbm_to_vmem [thread:$0]  %s1382_s0, 4096, %s19_s26, [#allocation4], %s1322_s28, %s1322_s28, %s1319_s21  }
  0x1a   :  { %s42_s7 = sshll.u32 %s1323_s6, 4  ;;  %s43_s7 = int_to_ptr.vmem [resolvable:$true] %s42_s7 }
  0x1b   :  { %s1280_s1 = scalar_lea.vmem %s43_s7, 512  ;;  %p1285_p11 = scmp.lt.s32.totalorder %s43_s7, %s43_s7 }
  0x1c   :  { %p1281_p10 = scmp.ne.s32.totalorder %s43_s7, %s1280_s1  ;;  %p1286_p12 = scmp.lt.s32.totalorder %s1280_s1, %s1280_s1 }
  0x1e   :  { %p1287_p13 = por %p1286_p12, %p1285_p11 }
  0x20   :  { %p1288_p0 = pnand %p1287_p13, %p1281_p10 }
  0x22   :  { %1291 = shalt.err (!%p1288_p0)
}
  0x23   :  { %s1324_s8 = smov 128   ;;  %s1325_s9 = smov 8  }
  0x24   :  { %48 = dma.hbm_to_vmem [thread:$0]  %s1384_s2, 512, %s43_s7, [#allocation7], %s1324_s8, %s1324_s8, %s1325_s9  }
  0x25   :  { %1312 = dma.done.wait [#allocation4], 4096  }
  0x26   :  { %1313 = vsyncadd [#allocation4], 4294963200 }
  0x27   :  { %1314 = dma.done.wait [#allocation7], 8704  }
  0x28   :  { %1315 = vsyncadd [#allocation7], 4294958592  ;;  %v1160_v0 = vld [vmem:[#allocation6 + $0x78] sm:$0xff]   ;;  %v1164_v4 = vld [vmem:[#allocation6 + $0x70] sm:$0xff]   ;;  %s1326_s14 = smov [#allocation9]  }
  0x29   :  { %v1161_v1 = vld [vmem:[#allocation6 + $0xf8] sm:$0xff]   ;;  %1039 = vmatprep.subr.bf16.mxu0 %v1160_v0  ;;  %v1165_v5 = vld [vmem:[#allocation6 + $0xf0] sm:$0xff]   ;;  %v1168_v8 = vld [vmem:[#allocation6 + $0x68] sm:$0xff]  }
  0x2a   :  { %v1162_v2 = vld [vmem:[#allocation6 + $0x38] sm:$0xff]   ;;  %1067 = vmatprep.subr.bf16.mxu1 %v1161_v1  ;;  %v1166_v6 = vld [vmem:[#allocation6 + $0x30] sm:$0xff]   ;;  %v1169_v9 = vld [vmem:[#allocation6 + $0xe8] sm:$0xff]  }
  0x2b   :  { %v1163_v3 = vld [vmem:[#allocation6 + $0xb8] sm:$0xff]   ;;  %1040 = vmatpush3.bf16.msra.mxu0 %v1162_v2  ;;  %v1167_v7 = vld [vmem:[#allocation6 + $0xb0] sm:$0xff]   ;;  %v1170_v10 = vld [vmem:[#allocation6 + $0x28] sm:$0xff]  }
  0x2c   :  { %1068 = vmatpush3.bf16.msra.mxu1 %v1163_v3  ;;  %1041 = vmatprep.subr.bf16.mxu0 %v1164_v4  ;;  %v1171_v11 = vld [vmem:[#allocation6 + $0xa8] sm:$0xff]   ;;  %v1172_v12 = vld [vmem:[#allocation6 + $0x60] sm:$0xff]   ;;  %v1176_v16 = vld [vmem:[#allocation6 + $0x58] sm:$0xff]  }
  0x2d   :  { %1069 = vmatprep.subr.bf16.mxu1 %v1165_v5  ;;  %v1173_v13 = vld [vmem:[#allocation6 + $0xe0] sm:$0xff]   ;;  %v1177_v17 = vld [vmem:[#allocation6 + $0xd8] sm:$0xff]   ;;  %v1180_v20 = vld [vmem:[#allocation6 + $0x50] sm:$0xff]  }
  0x2e   :  { %v1174_v14 = vld [vmem:[#allocation6 + $0x20] sm:$0xff]   ;;  %v1178_v18 = vld [vmem:[#allocation6 + $0x18] sm:$0xff]   ;;  %v1181_v21 = vld [vmem:[#allocation6 + $0xd0] sm:$0xff]  }
  0x2f   :  { %1042 = vmatpush3.bf16.msra.mxu0 %v1166_v6  ;;  %v1175_v15 = vld [vmem:[#allocation6 + $0xa0] sm:$0xff]   ;;  %v1179_v19 = vld [vmem:[#allocation6 + $0x98] sm:$0xff]   ;;  %v1182_v22 = vld [vmem:[#allocation6 + $0x10] sm:$0xff]  }
  0x30   :  { %1070 = vmatpush3.bf16.msra.mxu1 %v1167_v7  ;;  %1043 = vmatprep.subr.bf16.mxu0 %v1168_v8  ;;  %v1183_v23 = vld [vmem:[#allocation6 + $0x90] sm:$0xff]   ;;  %v1184_v24 = vld [vmem:[#allocation6 + $0x48] sm:$0xff]   ;;  %v1188_v28 = vld [vmem:[#allocation6 + $0x40] sm:$0xff]  }
  0x31   :  { %1071 = vmatprep.subr.bf16.mxu1 %v1169_v9  ;;  %v1185_v25 = vld [vmem:[#allocation6 + $0xc8] sm:$0xff]   ;;  %v1189_v29 = vld [vmem:[#allocation6 + $0xc0] sm:$0xff]   ;;  %v82_v34 = vld [vmem:[#allocation3 + $0x18] sm:$0xff] }
  0x32   :  { %v1186_v26 = vld [vmem:[#allocation6 + $0x8] sm:$0xff]   ;;  %v1190_v30 = vld [vmem:[#allocation6] sm:$0xff]   ;;  %v90_v36 = vld [vmem:[#allocation3 + $0x58] sm:$0xff] }
  0x33   :  { %1044 = vmatpush3.bf16.msra.mxu0 %v1170_v10  ;;  %v1187_v27 = vld [vmem:[#allocation6 + $0x88] sm:$0xff]   ;;  %v1191_v31 = vld [vmem:[#allocation6 + $0x80] sm:$0xff]   ;;  %v114_v39 = vpack.c.bf16 %v90_v36, %v82_v34  ;;  %v81_v41 = vld [vmem:[#allocation3 + $0x10] sm:$0xff] }
  0x34   :  { %1072 = vmatpush3.bf16.msra.mxu1 %v1171_v11  ;;  %1045 = vmatprep.subr.bf16.mxu0 %v1172_v12  ;;  %v80_v32 = vld [vmem:[#allocation3 + $0x8] sm:$0xff]  ;;  %v79_v37 = vld [vmem:[#allocation3] sm:$0xff]  ;;  %v89_v42 = vld [vmem:[#allocation3 + $0x50] sm:$0xff] }
  0x35   :  { %1073 = vmatprep.subr.bf16.mxu1 %v1173_v13  ;;  %v88_v33 = vld [vmem:[#allocation3 + $0x48] sm:$0xff]  ;;  %v87_v38 = vld [vmem:[#allocation3 + $0x40] sm:$0xff]  ;;  %v113_v43 = vpack.c.bf16 %v89_v42, %v81_v41  ;;  %v1192_v44 = vld [vmem:[#allocation6 + $0x178] sm:$0xff]   ;;  %720 = vmatprep.mubr.bf16.mxu1 %v114_v39 }
  0x36   :  { %v112_v35 = vpack.c.bf16 %v88_v33, %v80_v32  ;;  %v111_v40 = vpack.c.bf16 %v87_v38, %v79_v37  ;;  %v1193_v45 = vld [vmem:[#allocation6 + $0x1f8] sm:$0xff]   ;;  %v1196_v48 = vld [vmem:[#allocation6 + $0x170] sm:$0xff]   ;;  %v1200_v52 = vld [vmem:[#allocation6 + $0x168] sm:$0xff]  }
  0x37   :  { %1046 = vmatpush3.bf16.msra.mxu0 %v1174_v14  ;;  %v1194_v46 = vld [vmem:[#allocation6 + $0x138] sm:$0xff]   ;;  %v1197_v49 = vld [vmem:[#allocation6 + $0x1f0] sm:$0xff]   ;;  %v1201_v53 = vld [vmem:[#allocation6 + $0x1e8] sm:$0xff]  }
  0x38   :  { %1074 = vmatpush3.bf16.msra.mxu1 %v1175_v15  ;;  %1047 = vmatprep.subr.bf16.mxu0 %v1176_v16  ;;  %v1195_v47 = vld [vmem:[#allocation6 + $0x1b8] sm:$0xff]   ;;  %v1198_v50 = vld [vmem:[#allocation6 + $0x130] sm:$0xff]   ;;  %v1202_v54 = vld [vmem:[#allocation6 + $0x128] sm:$0xff]  }
  0x39   :  { %1075 = vmatprep.subr.bf16.mxu1 %v1177_v17  ;;  %671 = vmatprep.mubr.bf16.mxu0 %v112_v35  ;;  %v1199_v51 = vld [vmem:[#allocation6 + $0x1b0] sm:$0xff]   ;;  %v1203_v55 = vld [vmem:[#allocation6 + $0x1a8] sm:$0xff]   ;;  %v1204_v56 = vld [vmem:[#allocation6 + $0x160] sm:$0xff]  }
  0x3a   :  { %v1205_v57 = vld [vmem:[#allocation6 + $0x1e0] sm:$0xff]   ;;  %v1208_v60 = vld [vmem:[#allocation6 + $0x158] sm:$0xff]   ;;  %v96_v62 = vld [vmem:[#allocation3 + $0x88] sm:$0xff] }
  0x3b   :  { %1048 = vmatpush3.bf16.msra.mxu0 %v1178_v18  ;;  %v1206_v58 = vld [vmem:[#allocation6 + $0x120] sm:$0xff]   ;;  %v1209_v61 = vld [vmem:[#allocation6 + $0x1d8] sm:$0xff]   ;;  %v104_v63 = vld [vmem:[#allocation3 + $0xc8] sm:$0xff] }
  0x3c   :  { %1076 = vmatpush3.bf16.msra.mxu1 %v1179_v19  ;;  %1049 = vmatprep.subr.bf16.mxu0 %v1180_v20  ;;  %v1207_v59 = vld [vmem:[#allocation6 + $0x1a0] sm:$0xff]   ;;  %v98_v0 = vld [vmem:[#allocation3 + $0x98] sm:$0xff]  ;;  %v120_v2 = vpack.c.bf16 %v104_v63, %v96_v62  ;;  %v97_v8 = vld [vmem:[#allocation3 + $0x90] sm:$0xff] }
  0x3d   :  { %1077 = vmatprep.subr.bf16.mxu1 %v1181_v21  ;;  %v106_v1 = vld [vmem:[#allocation3 + $0xd8] sm:$0xff]  ;;  %v95_v6 = vld [vmem:[#allocation3 + $0x80] sm:$0xff]  ;;  %v105_v10 = vld [vmem:[#allocation3 + $0xd0] sm:$0xff] }
  0x3e   :  { %v122_v3 = vpack.c.bf16 %v106_v1, %v98_v0  ;;  %v1210_v4 = vld [vmem:[#allocation6 + $0x118] sm:$0xff]   ;;  %v103_v7 = vld [vmem:[#allocation3 + $0xc0] sm:$0xff]  ;;  %v121_v11 = vpack.c.bf16 %v105_v10, %v97_v8  ;;  %v1212_v12 = vld [vmem:[#allocation6 + $0x150] sm:$0xff]  }
  0x3f   :  { %1050 = vmatpush3.bf16.msra.mxu0 %v1182_v22  ;;  %v1211_v5 = vld [vmem:[#allocation6 + $0x198] sm:$0xff]   ;;  %v119_v9 = vpack.c.bf16 %v103_v7, %v95_v6  ;;  %v1213_v13 = vld [vmem:[#allocation6 + $0x1d0] sm:$0xff]   ;;  %v1216_v16 = vld [vmem:[#allocation6 + $0x148] sm:$0xff]  }
  0x40   :  { %1078 = vmatpush3.bf16.msra.mxu1 %v1183_v23  ;;  %1051 = vmatprep.subr.bf16.mxu0 %v1184_v24  ;;  %v1214_v14 = vld [vmem:[#allocation6 + $0x110] sm:$0xff]   ;;  %v1217_v17 = vld [vmem:[#allocation6 + $0x1c8] sm:$0xff]   ;;  %v1220_v20 = vld [vmem:[#allocation6 + $0x140] sm:$0xff]  }
  0x41   :  { %1079 = vmatprep.subr.bf16.mxu1 %v1185_v25  ;;  %v1215_v15 = vld [vmem:[#allocation6 + $0x190] sm:$0xff]   ;;  %v1218_v18 = vld [vmem:[#allocation6 + $0x108] sm:$0xff]   ;;  %v1221_v21 = vld [vmem:[#allocation6 + $0x1c0] sm:$0xff]  }
  0x42   :  { %v1219_v19 = vld [vmem:[#allocation6 + $0x188] sm:$0xff]   ;;  %v1222_v22 = vld [vmem:[#allocation6 + $0x100] sm:$0xff]   ;;  %v85_v32 = vld [vmem:[#allocation3 + $0x30] sm:$0xff] }
  0x43   :  { %1052 = vmatpush3.bf16.msra.mxu0 %v1186_v26  ;;  %v1223_v23 = vld [vmem:[#allocation6 + $0x180] sm:$0xff]   ;;  %v84_v24 = vld [vmem:[#allocation3 + $0x28] sm:$0xff]  ;;  %v93_v33 = vld [vmem:[#allocation3 + $0x70] sm:$0xff] }
  0x44   :  { %1080 = vmatpush3.bf16.msra.mxu1 %v1187_v27  ;;  %1053 = vmatprep.subr.bf16.mxu0 %v1188_v28  ;;  %v92_v25 = vld [vmem:[#allocation3 + $0x68] sm:$0xff]  ;;  %v86_v27 = vld [vmem:[#allocation3 + $0x38] sm:$0xff]  ;;  %v117_v35 = vpack.c.bf16 %v93_v33, %v85_v32  ;;  %v99_v42 = vld [vmem:[#allocation3 + $0xa0] sm:$0xff] }
  0x45   :  { %1081 = vmatprep.subr.bf16.mxu1 %v1189_v29  ;;  %v116_v26 = vpack.c.bf16 %v92_v25, %v84_v24  ;;  %v94_v28 = vld [vmem:[#allocation3 + $0x78] sm:$0xff]  ;;  %v83_v29 = vld [vmem:[#allocation3 + $0x20] sm:$0xff]  ;;  %v100_v36 = vld [vmem:[#allocation3 + $0xa8] sm:$0xff] }
  0x46   :  { %v108_v37 = vld [vmem:[#allocation3 + $0xe8] sm:$0xff]  ;;  %v102_v38 = vld [vmem:[#allocation3 + $0xb8] sm:$0xff] }
  0x47   :  { %1054 = vmatpush3.bf16.msra.mxu0 %v1190_v30  ;;  %v118_v30 = vpack.c.bf16 %v94_v28, %v86_v27  ;;  %v124_v39 = vpack.c.bf16 %v108_v37, %v100_v36 }
  0x48   :  { %1082 = vmatpush3.bf16.msra.mxu1 %v1191_v31  ;;  %1095 = vmatprep.subr.bf16.mxu0 %v1192_v44  ;;  %v91_v31 = vld [vmem:[#allocation3 + $0x60] sm:$0xff]  ;;  %v101_v44 = vld [vmem:[#allocation3 + $0xb0] sm:$0xff] }
  0x49   :  { %1123 = vmatprep.subr.bf16.mxu1 %v1193_v45  ;;  %v115_v34 = vpack.c.bf16 %v91_v31, %v83_v29  ;;  %v109_v45 = vld [vmem:[#allocation3 + $0xf0] sm:$0xff] }
  0x4a   :  { %672 = vmatmul.mubr.bf16.vlgmr.msra.gmra.mxu0 %v111_v40  ;;  %v110_v40 = vld [vmem:[#allocation3 + $0xf8] sm:$0xff] }
  0x4b   :  { %721 = vmatmul.mubr.bf16.vlgmr.msra.gmra.mxu1 %v113_v43  ;;  %1096 = vmatpush3.bf16.msra.mxu0 %v1194_v46  ;;  %v126_v41 = vpack.c.bf16 %v110_v40, %v102_v38  ;;  %v107_v43 = vld [vmem:[#allocation3 + $0xe0] sm:$0xff] }
  0x4c   :  { %1124 = vmatpush3.bf16.msra.mxu1 %v1195_v47  ;;  %1097 = vmatprep.subr.bf16.mxu0 %v1196_v48  ;;  %v123_v46 = vpack.c.bf16 %v107_v43, %v99_v42  ;;  %v125_v47 = vpack.c.bf16 %v109_v45, %v101_v44  ;;  %v69_v42 = vld [vmem:[#allocation8 + $0x10] sm:$0xff] }
  0x4d   :  { %1125 = vmatprep.subr.bf16.mxu1 %v1197_v49  ;;  %679 = vmatprep.mubr.bf16.mxu0 %v120_v2 }
  0x4e   :  { %728 = vmatprep.mubr.bf16.mxu1 %v122_v3 }
  0x4f   :  { %1098 = vmatpush3.bf16.msra.mxu0 %v1198_v50 }
  0x50   :  { %1126 = vmatpush3.bf16.msra.mxu1 %v1199_v51  ;;  %1099 = vmatprep.subr.bf16.mxu0 %v1200_v52 }
  0x51   :  { %1127 = vmatprep.subr.bf16.mxu1 %v1201_v53 }
  0x52   :  { %680 = vmatmul.mubr.bf16.gmra.mxu0 %v119_v9 }
  0x53   :  { %1100 = vmatpush3.bf16.msra.mxu0 %v1202_v54  ;;  %729 = vmatmul.mubr.bf16.gmra.mxu1 %v121_v11 }
  0x54   :  { %1128 = vmatpush3.bf16.msra.mxu1 %v1203_v55  ;;  %1101 = vmatprep.subr.bf16.mxu0 %v1204_v56 }
  0x55   :  { %1129 = vmatprep.subr.bf16.mxu1 %v1205_v57  ;;  %769 = vmatprep.mubr.bf16.mxu0 %v116_v26 }
  0x56   :  { %818 = vmatprep.mubr.bf16.mxu1 %v118_v30  ;;  %v68_v30 = vld [vmem:[#allocation8 + $0x8] sm:$0xff] }
  0x57   :  { %1102 = vmatpush3.bf16.msra.mxu0 %v1206_v58 }
  0x58   :  { %1130 = vmatpush3.bf16.msra.mxu1 %v1207_v59  ;;  %1103 = vmatprep.subr.bf16.mxu0 %v1208_v60 }
  0x59   :  { %1131 = vmatprep.subr.bf16.mxu1 %v1209_v61 }
  0x5b   :  { %1104 = vmatpush3.bf16.msra.mxu0 %v1210_v4 }
  0x5c   :  { %1132 = vmatpush3.bf16.msra.mxu1 %v1211_v5  ;;  %1105 = vmatprep.subr.bf16.mxu0 %v1212_v12 }
  0x5d   :  { %1133 = vmatprep.subr.bf16.mxu1 %v1213_v13 }
  0x5f   :  { %1106 = vmatpush3.bf16.msra.mxu0 %v1214_v14 }
  0x60   :  { %1134 = vmatpush3.bf16.msra.mxu1 %v1215_v15  ;;  %1107 = vmatprep.subr.bf16.mxu0 %v1216_v16 }
  0x61   :  { %1135 = vmatprep.subr.bf16.mxu1 %v1217_v17 }
  0x63   :  { %1108 = vmatpush3.bf16.msra.mxu0 %v1218_v18  ;;  %v67_v18 = vld [vmem:[#allocation8] sm:$0xff] }
  0x64   :  { %1136 = vmatpush3.bf16.msra.mxu1 %v1219_v19  ;;  %1109 = vmatprep.subr.bf16.mxu0 %v1220_v20 }
  0x65   :  { %1137 = vmatprep.subr.bf16.mxu1 %v1221_v21 }
  0x67   :  { %1110 = vmatpush3.bf16.msra.mxu0 %v1222_v22 }
  0x68   :  { %1138 = vmatpush3.bf16.msra.mxu1 %v1223_v23 }
  0x6a   :  { %770 = vmatmul.mubr.bf16.vlgmr.msra.gmra.mxu0 %v115_v34 }
  0x6b   :  { %819 = vmatmul.mubr.bf16.vlgmr.msra.gmra.mxu1 %v117_v35  ;;  %777 = vmatprep.mubr.bf16.mxu0 %v124_v39 }
  0x6c   :  { %826 = vmatprep.mubr.bf16.mxu1 %v126_v41 }
  0x72   :  { %778 = vmatmul.mubr.bf16.gmra.mxu0 %v123_v46 }
  0x73   :  { %827 = vmatmul.mubr.bf16.gmra.mxu1 %v125_v47 }
 0x10a   :  { %v1055_v48 = vpop.f32.mrf.mxu0 }
 0x10b   :  { %v1083_v49 = vpop.f32.mrf.mxu1 }
 0x10c   :  { %v1056_v50 = vpop.f32.mrf.mxu0 }
 0x10d   :  { %v1084_v51 = vpop.f32.mrf.mxu1  ;;  %v1057_v0 = vadd.f32 %v1056_v50, %v1055_v48 }
 0x10e   :  { %v1058_v52 = vpop.f32.mrf.mxu0  ;;  %v1085_v1 = vadd.f32 %v1084_v51, %v1083_v49  ;;  %v70_v49 = vld [vmem:[#allocation8 + $0x18] sm:$0xff] }
 0x10f   :  { %v1086_v53 = vpop.f32.mrf.mxu1 }
 0x110   :  { %v1059_v54 = vpop.f32.mrf.mxu0  ;;  %v723_v6 = vadd.f32 %v1085_v1, %v1057_v0 }
 0x111   :  { %v1087_v55 = vpop.f32.mrf.mxu1  ;;  %v1060_v7 = vadd.f32 %v1059_v54, %v1058_v52 }
 0x112   :  { %v1061_v56 = vpop.f32.mrf.mxu0  ;;  %v1088_v8 = vadd.f32 %v1087_v55, %v1086_v53 }
 0x113   :  { %v1089_v57 = vpop.f32.mrf.mxu1 }
 0x114   :  { %v1062_v58 = vpop.f32.mrf.mxu0  ;;  %v726_v19 = vadd.f32 %v1088_v8, %v1060_v7 }
 0x115   :  { %v1090_v59 = vpop.f32.mrf.mxu1  ;;  %v1063_v14 = vadd.f32 %v1062_v58, %v1061_v56 }
 0x116   :  { %v1064_v60 = vpop.f32.mrf.mxu0  ;;  %v1091_v15 = vadd.f32 %v1090_v59, %v1089_v57 }
 0x117   :  { %v1092_v61 = vpop.f32.mrf.mxu1 }
 0x118   :  { %v1065_v62 = vpop.f32.mrf.mxu0  ;;  %v731_v27 = vadd.f32 %v1091_v15, %v1063_v14 }
 0x119   :  { %v1093_v63 = vpop.f32.mrf.mxu1  ;;  %v1066_v31 = vadd.f32 %v1065_v62, %v1064_v60 }
 0x11a   :  { %v1094_v32 = vadd.f32 %v1093_v63, %v1092_v61 }
 0x11c   :  { %v734_v43 = vadd.f32 %v1094_v32, %v1066_v31 }
 0x12a   :  { %v1111_v2 = vpop.f32.mrf.mxu0 }
 0x12b   :  { %v1139_v3 = vpop.f32.mrf.mxu1 }
 0x12c   :  { %v1112_v4 = vpop.f32.mrf.mxu0 }
 0x12d   :  { %v1140_v5 = vpop.f32.mrf.mxu1  ;;  %v1113_v9 = vadd.f32 %v1112_v4, %v1111_v2 }
 0x12e   :  { %v1114_v10 = vpop.f32.mrf.mxu0  ;;  %v1141_v13 = vadd.f32 %v1140_v5, %v1139_v3 }
 0x12f   :  { %v1142_v11 = vpop.f32.mrf.mxu1  ;;  %v772_v12 = vadd.f32 %v1113_v9, %v723_v6 }
 0x130   :  { %v1115_v16 = vpop.f32.mrf.mxu0 }
 0x131   :  { %v1143_v17 = vpop.f32.mrf.mxu1  ;;  %v821_v20 = vadd.f32 %v1141_v13, %v772_v12  ;;  %v1116_v21 = vadd.f32 %v1115_v16, %v1114_v10 }
 0x132   :  { %v1117_v22 = vpop.f32.mrf.mxu0  ;;  %v1144_v25 = vadd.f32 %v1143_v17, %v1142_v11 }
 0x133   :  { %v1145_v23 = vpop.f32.mrf.mxu1  ;;  %v775_v24 = vadd.f32 %v1116_v21, %v726_v19  ;;  %v835_v26 = vadd.f32 %v821_v20, %v67_v18  ;;  %v1018_v18 = vld [vmem:[%s1385_s3] ss:$0 sm:$0xff]  ;;  %s941_s3 = sshll.u32 %s1326_s14, 4  ;;  %s942_s3 = int_to_ptr.vmem [resolvable:$true] %s941_s3 }
 0x134   :  { %v1118_v28 = vpop.f32.mrf.mxu0  ;;  %s1292_s15 = scalar_lea.vmem %s942_s3, 256  ;;  %p1297_p2 = scmp.lt.s32.totalorder %s942_s3, %s942_s3 }
 0x135   :  { %v1146_v29 = vpop.f32.mrf.mxu1  ;;  %v824_v33 = vadd.f32 %v1144_v25, %v775_v24  ;;  %v1119_v34 = vadd.f32 %v1118_v28, %v1117_v22  ;;  %850 = vadd.xlane.f32.xlu0 %v835_v26  ;;  %v1019_v22 = vld [vmem:[%s1386_s4] ss:$0 sm:$0xff]  ;;  %p1293_p1 = scmp.ne.s32.totalorder %s942_s3, %s1292_s15  ;;  %p1298_p3 = scmp.lt.s32.totalorder %s1292_s15, %s1292_s15 }
 0x136   :  { %v1120_v35 = vpop.f32.mrf.mxu0  ;;  %v1147_v38 = vadd.f32 %v1146_v29, %v1145_v23 }
 0x137   :  { %v1148_v36 = vpop.f32.mrf.mxu1  ;;  %v780_v37 = vadd.f32 %v1119_v34, %v731_v27  ;;  %v836_v39 = vadd.f32 %v824_v33, %v68_v30  ;;  %p1299_p4 = por %p1298_p3, %p1297_p2 }
 0x138   :  { %v1121_v40 = vpop.f32.mrf.mxu0 }
 0x139   :  { %v1149_v41 = vpop.f32.mrf.mxu1  ;;  %v829_v44 = vadd.f32 %v1147_v38, %v780_v37  ;;  %v1122_v45 = vadd.f32 %v1121_v40, %v1120_v35  ;;  %852 = vadd.xlane.f32.xlu0 %v836_v39  ;;  %p1300_p5 = pnand %p1299_p4, %p1293_p1 }
 0x13a   :  { %v1150_v47 = vadd.f32 %v1149_v41, %v1148_v36 }
 0x13b   :  { %v783_v46 = vadd.f32 %v1122_v45, %v734_v43  ;;  %v837_v48 = vadd.f32 %v829_v44, %v69_v42 }
 0x13d   :  { %v832_v50 = vadd.f32 %v1150_v47, %v783_v46  ;;  %854 = vadd.xlane.f32.xlu1 %v837_v48 }
 0x13f   :  { %v838_v51 = vadd.f32 %v832_v50, %v70_v49 }
 0x141   :  { %856 = vadd.xlane.f32.xlu1 %v838_v51 }
 0x1be   :  { %v851_v52 = vpop.xlane.xlu0 %850 }
 0x1bf   :  { %v858_v53 = vmul.f32 0.0078125, %v851_v52 }
 0x1c1   :  { %v862_v54 = vsub.f32 %v835_v26, %v858_v53 }
 0x1c2   :  { %v853_v55 = vpop.xlane.xlu0 %852 }
 0x1c3   :  { %v859_v56 = vmul.f32 0.0078125, %v853_v55  ;;  %v866_v57 = vmul.f32 %v862_v54, %v862_v54 }
 0x1c5   :  { %v863_v58 = vsub.f32 %v836_v39, %v859_v56  ;;  %870 = vadd.xlane.f32.xlu0 %v866_v57 }
 0x1c6   :  { %v855_v59 = vpop.xlane.xlu1 %854 }
 0x1c7   :  { %v860_v60 = vmul.f32 0.0078125, %v855_v59  ;;  %v867_v61 = vmul.f32 %v863_v58, %v863_v58 }
 0x1c9   :  { %v864_v62 = vsub.f32 %v837_v48, %v860_v60  ;;  %872 = vadd.xlane.f32.xlu1 %v867_v61 }
 0x1ca   :  { %v857_v63 = vpop.xlane.xlu1 %856 }
 0x1cb   :  { %v861_v0 = vmul.f32 0.0078125, %v857_v63  ;;  %v868_v1 = vmul.f32 %v864_v62, %v864_v62 }
 0x1cd   :  { %v865_v2 = vsub.f32 %v838_v51, %v861_v0  ;;  %874 = vadd.xlane.f32.xlu0 %v868_v1 }
 0x1cf   :  { %v869_v3 = vmul.f32 %v865_v2, %v865_v2 }
 0x1d1   :  { %876 = vadd.xlane.f32.xlu1 %v869_v3 }
 0x24e   :  { %v871_v4 = vpop.xlane.xlu0 %870 }
 0x24f   :  { %v878_v5 = vmul.f32 0.0078125, %v871_v4 }
 0x251   :  { %v882_v6 = vadd.f32 1e-12, %v878_v5 }
 0x252   :  { %v873_v7 = vpop.xlane.xlu1 %872 }
 0x253   :  { %1224 = vrsqrt.f32 %v882_v6  ;;  %v879_v8 = vmul.f32 0.0078125, %v873_v7 }
 0x255   :  { %v883_v9 = vadd.f32 1e-12, %v879_v8 }
 0x256   :  { %v875_v10 = vpop.xlane.xlu0 %874 }
 0x257   :  { %1226 = vrsqrt.f32 %v883_v9  ;;  %v880_v11 = vmul.f32 0.0078125, %v875_v10 }
 0x259   :  { %v884_v12 = vadd.f32 1e-12, %v880_v11 }
 0x25a   :  { %v877_v13 = vpop.xlane.xlu1 %876 }
 0x25b   :  { %1228 = vrsqrt.f32 %v884_v12  ;;  %v881_v14 = vmul.f32 0.0078125, %v877_v13 }
 0x25d   :  { %v885_v15 = vadd.f32 1e-12, %v881_v14 }
 0x25f   :  { %1230 = vrsqrt.f32 %v885_v15 }
 0x260   :  { %v1225_v16 = vpop.eup %1224 }
 0x261   :  { %v890_v17 = vmul.f32 %v1225_v16, %v862_v54 }
 0x263   :  { %v901_v21 = vmul.f32 %v1018_v18, %v890_v17 }
 0x264   :  { %v1227_v19 = vpop.eup %1226 }
 0x265   :  { %v891_v20 = vmul.f32 %v1227_v19, %v863_v58  ;;  %v912_v26 = vadd.f32 %v1019_v22, %v901_v21 }
 0x267   :  { %v902_v23 = vmul.f32 %v1018_v18, %v891_v20 }
 0x268   :  { %v1229_v24 = vpop.eup %1228 }
 0x269   :  { %v892_v25 = vmul.f32 %v1229_v24, %v864_v62  ;;  %v913_v27 = vadd.f32 %v1019_v22, %v902_v23 }
 0x26b   :  { %v1031_v28 = vpack.c.bf16 %v913_v27, %v912_v26  ;;  %v903_v31 = vmul.f32 %v1018_v18, %v892_v25 }
 0x26c   :  { %v1231_v29 = vpop.eup %1230 }
 0x26d   :  { %v893_v30 = vmul.f32 %v1231_v29, %v865_v2  ;;  %1032 = vst [vmem:[#allocation9] sm:$0xff] %v1031_v28   ;;  %v914_v33 = vadd.f32 %v1019_v22, %v903_v31 }
 0x26f   :  { %v904_v32 = vmul.f32 %v1018_v18, %v893_v30 }
 0x271   :  { %v915_v34 = vadd.f32 %v1019_v22, %v904_v32 }
 0x273   :  { %v1036_v35 = vpack.c.bf16 %v915_v34, %v914_v33 }
 0x275   :  { %1038 = vst [vmem:[#allocation9 + $0x8] sm:$0xff] %v1036_v35  }
 0x276   :  { %1303 = shalt.err (!%p1300_p5)
}
 0x277   :  { %947 = dma.vmem_to_hbm [thread:$0]  %s942_s3, 256, %s1387_s5, [#allocation5], %s1319_s21, %s1319_s21, %s1320_s22  }
 0x278   :  { %1316 = dma.done.wait [#allocation5], 256  }
 0x279   :  { %1317 = vsyncadd [#allocation5], 4294967040 }
 0x27a   :  { %951 = vsyncpa [#allocation4], 1 }
 0x27b   :  { %952 = vsyncpa [#allocation7], 1 }
 0x27c   :  { %953 = vsyncpa [#allocation5], 1 }

</bundles_post_ra>
